<compile_context>
chip_gen: v7x
topology: tpu7x:2x2x1
jax: 0.10.0
libtpu: 0.0.40
codegen_flags: <defaults>
</compile_context>

<pallas_src>
import jax
import jax.numpy as jnp
from jax.experimental import pallas as pl
from jax.experimental.pallas import tpu as pltpu  # noqa: F401  (TPU backend)

# ----------------------------- problem sizes --------------------------------
B, L = 2, 8            # batch, seq_len
D_INP = 4              # freq='h' -> freq_map['h'] = 4
D_MODEL = 32           # d_model


# ------------------------------ kernel ---------------------------------------
def time_feature_embedding_kernel(x_ref, w_ref, o_ref):
    # x_ref: (B*L, D_INP)   w_ref: (D_INP, D_MODEL)   o_ref: (B*L, D_MODEL)
    o_ref[...] = jnp.dot(
        x_ref[...], w_ref[...], preferred_element_type=jnp.float32
    ).astype(o_ref.dtype)


# ------------------------------ wrapper ---------------------------------------
def time_feature_embedding(x, weight):
    """x: (B, L, d_inp) float32; weight: (d_model, d_inp) (PyTorch nn.Linear layout)."""
    b, l, d_inp = x.shape
    d_model = weight.shape[0]

    x2d = x.reshape(b * l, d_inp)      # flatten batch+seq into MXU M dimension
    w_t = weight.T                      # (d_inp, d_model) — one-time layout fix, outside kernel

    out2d = pl.pallas_call(
        time_feature_embedding_kernel,
        out_shape=jax.ShapeDtypeStruct((b * l, d_model), jnp.float32),
        in_specs=[
            pl.BlockSpec((b * l, d_inp), lambda: (0, 0)),
            pl.BlockSpec((d_inp, d_model), lambda: (0, 0)),
        ],
        out_specs=pl.BlockSpec((b * l, d_model), lambda: (0, 0)),
    )(x2d, w_t)

    return out2d.reshape(b, l, d_model)


time_feature_embedding_jit = jax.jit(time_feature_embedding)


# -------------------------------- main ----------------------------------------
if __name__ == "__main__":
    key = jax.random.PRNGKey(0)
    kx, kw = jax.random.split(key, 2)

    x = jax.random.normal(kx, (B, L, D_INP), jnp.float32)
    # nn.Linear(d_inp, d_model, bias=False).weight has shape (d_model, d_inp)
    weight = jax.random.normal(kw, (D_MODEL, D_INP), jnp.float32) * 0.02

    out = time_feature_embedding_jit(x, weight)
    out = jax.block_until_ready(out)

    # correctness check against the pure-JAX reference of the PyTorch forward
    ref = jnp.einsum('bld,md->blm', x, weight)
    assert out.shape == (B, L, D_MODEL)
    assert jnp.allclose(out, ref, atol=1e-5, rtol=1e-5)

    print("KERNEL_OK")
</pallas_src>

<mosaic_0001>
module attributes {stable_mosaic.version = 11 : i64} {
  func.func @time_feature_embedding_kernel(%arg0: memref<16x4xf32, #tpu.memory_space<vmem>>, %arg1: memref<4x32xf32, #tpu.memory_space<vmem>>, %arg2: memref<16x32xf32, #tpu.memory_space<vmem>>) attributes {dimension_semantics = [], scalar_prefetch = 0 : i64, scratch_operands = 0 : i64, tpu.core_type = #tpu.core_type<tc>} {
    %c0 = arith.constant 0 : index
    %c0_0 = arith.constant 0 : index
    %0 = vector.load %arg0[%c0, %c0_0] : memref<16x4xf32, #tpu.memory_space<vmem>>, vector<16x4xf32>
    %c0_1 = arith.constant 0 : index
    %c0_2 = arith.constant 0 : index
    %1 = vector.load %arg1[%c0_1, %c0_2] : memref<4x32xf32, #tpu.memory_space<vmem>>, vector<4x32xf32>
    %cst = arith.constant dense<0.000000e+00> : vector<16x32xf32>
    %2 = tpu.matmul %0, %1, %cst {dimension_numbers = #tpu.dot_dimension_numbers<[1], [0], [0], [1], [0, 0, 1, 1], [], []>} : vector<16x4xf32>, vector<4x32xf32>, vector<16x32xf32> -> vector<16x32xf32>
    %c0_3 = arith.constant 0 : index
    %c0_4 = arith.constant 0 : index
    %3 = vector.load %arg2[%c0_3, %c0_4] : memref<16x32xf32, #tpu.memory_space<vmem>>, vector<16x32xf32>
    tpu.vector_store %arg2[%c0_3, %c0_4], %2 {strides = array<i32>} : memref<16x32xf32, #tpu.memory_space<vmem>>, vector<16x32xf32>,
    return
  }
}

</mosaic_0001>

<bundles_post_ra>
// kernel: time_feature_embedding.1
= control target key start
LH: loop header
LB: loop body
LE: loop exit
PB: predicated region body
PF: predicated region fallthrough
CT: control target
= control target key end

     0   :  { %vm22_vm0 = vcmask 1043456   ;;  %vm15_vm1 = vcmask 31744   ;;  %s197_s0 = inlined_call_operand.vmem [shape: f32[16,4], index: 0, kind: input, shape index: {}]   ;;  %s198_s1 = inlined_call_operand.vmem [shape: f32[4,32], index: 1, kind: input, shape index: {}]   ;;  %s199_s2 = inlined_call_operand.hbm [shape: f32[16,32], index: 2, kind: output, shape index: {}]  }
   0x1   :  { %v14_v0 = vld [vmem:[%s198_s1] sm:$0xf]  ;;  %v13_v2 = vld [vmem:[%s197_s0 + $0x8] sm:$0xff] }
   0x2   :  { %v12_v1 = vld [vmem:[%s197_s0] sm:$0xff]  ;;  %126 = vmatprep.subr.msk.mxu0 %vm22_vm0, %v14_v0 }
   0x3   :  { %128 = vmatprep.mubr.msk.f32.mxu0 %vm15_vm1, %v12_v1 }
   0x4   :  { %7 = vsyncpa [#allocation3], 0  ;;  %127 = vmatpush3.msk.msra.mxu0 %vm22_vm0, %v14_v0  ;;  %s158_s15 = smov [#allocation2]   ;;  %vm101_vm2 = vcmask 261120  }
   0x5   :  { %129 = vmatmul.mubr.msk.f32.vlgmr.msra.gmra.mrb[0].mxu0 %vm15_vm1, %v13_v2  ;;  %s109_s16 = sshll.u32 %s158_s15, 4  ;;  %s110_s16 = int_to_ptr.vmem [resolvable:$true] %s109_s16 }
   0x6   :  { %s134_s1 = scalar_lea.vmem %s110_s16, 256  ;;  %p139_p1 = scmp.lt.s32.totalorder %s110_s16, %s110_s16 }
   0x7   :  { %p135_p0 = scmp.ne.s32.totalorder %s110_s16, %s134_s1  ;;  %p140_p2 = scmp.lt.s32.totalorder %s134_s1, %s134_s1 }
   0x9   :  { %p141_p3 = por %p140_p2, %p139_p1 }
   0xb   :  { %p142_p4 = pnand %p141_p3, %p135_p0 }
  0xd8   :  { %v130_v3 = vpop.f32.mrb[0].mxu0 }
  0xd9   :  { %103 = vst.msk [vmem:[#allocation2 + $0x8] sm:$0xff] %vm101_vm2, %v130_v3  ;;  %v92_v4 = vpop.f32.mrb[1].mxu0 }
  0xda   :  { %102 = vst.msk [vmem:[#allocation2] sm:$0xff] %vm101_vm2, %v92_v4 }
  0xdb   :  { %145 = shalt.err (!%p142_p4)
}
  0xdc   :  { %s146_s18 = scalar_lea.hbm %s199_s2, 256 }
  0xdd   :  { %p147_p5 = scmp.ne.s32.totalorder %s199_s2, %s146_s18  ;;  %p150_p6 = scmp.lt.u32.totalorder %s146_s18, %s199_s2 }
  0xdf   :  { %p152_p7 = pnand %p150_p6, %p147_p5 }
  0xe1   :  { %155 = shalt.err (!%p152_p7)
}
  0xe2   :  { %s159_s23 = smov 128   ;;  %s160_s24 = smov 8  }
  0xe3   :  { %115 = dma.vmem_to_hbm [thread:$0]  %s110_s16, 256, %s199_s2, [#allocation3], %s159_s23, %s159_s23, %s160_s24  }
  0xe4   :  { %156 = dma.done.wait [#allocation3], 256  }
  0xe5   :  { %157 = vsyncadd [#allocation3], 4294967040 }
  0xe6   :  { %119 = vsyncpa [#allocation3], 1 }

</bundles_post_ra>
